<compile_context>
chip_gen: v7x
topology: tpu7x:2x2x1
jax: 0.10.0
libtpu: 0.0.40
codegen_flags: <defaults>
</compile_context>

<pallas_src>
import functools
import math

import jax
import jax.numpy as jnp
from jax.experimental import pallas as pl
from jax.experimental.pallas import tpu as pltpu


def _round_up(x, m):
    return (x + m - 1) // m * m


def _loss_kernel(pred_ref, targ_ref, pwm1_ref, out_ref, *,
                 blocks_per_chunk, block_rows, row_width,
                 total_valid, mask_from_blk, needs_mask, approx_recip):
    """One (block_rows, W) tile of elementwise focal-BCE, reduced to a (1, W) partial sum
    accumulated into the resident per-chunk out block."""
    i = pl.program_id(1)

    @pl.when(i == 0)
    def _():
        out_ref[...] = jnp.zeros_like(out_ref)

    x = pred_ref[...].astype(jnp.float32)
    t = targ_ref[...].astype(jnp.float32)
    pwm1 = pwm1_ref[...]                      # (1, W) f32, broadcasts along sublanes

    # Numerically-stable BCE with logits + pos_weight (matches PyTorch):
    #   loss = (1 - t) * x + (1 + (pw - 1) * t) * softplus(-x)
    # with softplus(-x) = max(-x, 0) + log1p(exp(-|x|))
    e = jnp.exp(-jnp.abs(x))                  # exp(-|x|), reused for sigmoid below
    softplus_neg_x = jnp.maximum(-x, 0.0) + jnp.log1p(e)
    bce = (1.0 - t) * x + (1.0 + pwm1 * t) * softplus_neg_x

    # sigmoid(x) from the same exp(-|x|):  x>=0: 1/(1+e),  x<0: e/(1+e)
    if approx_recip:
        inv = pl.reciprocal(1.0 + e, approx=True)
    else:
        inv = 1.0 / (1.0 + e)
    prob = jnp.where(x >= 0.0, inv, e * inv)

    fw = (1.0 - prob) * t + prob * (1.0 - t)
    val = bce * (fw * fw)

    def accumulate(v):
        # Reduce the tile over rows (sublane axis) to a lane-dense (1, W) partial sum.
        out_ref[...] += jnp.sum(v, axis=0, keepdims=True)

    if needs_mask:
        gblk = pl.program_id(0) * blocks_per_chunk + i

        # Fully-valid blocks: no mask work at all.
        @pl.when(gblk < mask_from_blk)
        def _():
            accumulate(val)

        # Boundary / padded / dead blocks: zero out elements past the valid range
        # (jnp.where select, so garbage data cannot leak through as NaN*0).
        @pl.when(gblk >= mask_from_blk)
        def _():
            row_io = jax.lax.broadcasted_iota(jnp.int32, val.shape, 0)
            col_io = jax.lax.broadcasted_iota(jnp.int32, val.shape, 1)
            gidx = (gblk * block_rows + row_io) * row_width + col_io
            accumulate(jnp.where(gidx < total_valid, val, 0.0))
    else:
        accumulate(val)


def disease_classification_loss(predictions, targets, pos_weights, *,
                                block_rows=1024, target_chunks=2,
                                approx_reciprocal=False):
    """predictions, targets: (B, C); pos_weights: (C,). Returns scalar f32 mean loss."""
    B, C = predictions.shape
    assert targets.shape == (B, C)
    assert pos_weights.shape == (C,)
    total = B * C

    # Lane-dense, transpose-free layout: flatten row-major and view as (rows, W) with
    # W a multiple of 128 (lane width) and of C (so pos_weight is a per-lane pattern).
    W = C * 128 // math.gcd(C, 128)                        # lcm(C, 128)
    rows = _round_up(max(pl.cdiv(total, W), 8), 8)
    padded_total = rows * W

    flat_p = predictions.reshape(-1)
    flat_t = targets.reshape(-1)
    if padded_total != total:
        # Only when B*C doesn't tile exactly; otherwise the reshape is copy-free.
        # TODO(synk): producer-side class-major layout would remove this pad entirely.
        flat_p = jnp.pad(flat_p, (0, padded_total - total))
        flat_t = jnp.pad(flat_t, (0, padded_total - total))
    pred2 = flat_p.reshape(rows, W)
    targ2 = flat_t.reshape(rows, W)

    # Tiling / chunking. Chunk axis is "parallel" (engages both TCs on v7x); the inner
    # axis is the reduction ("arbitrary").
    br = max(8, min(_round_up(block_rows, 8), rows))
    n_blocks = pl.cdiv(rows, br)
    n_chunks = max(1, min(target_chunks, n_blocks))
    blocks_per_chunk = pl.cdiv(n_blocks, n_chunks)

    covered = n_chunks * blocks_per_chunk * br * W
    needs_mask = covered > total
    mask_from_blk = total // (br * W)        # first block that contains padded elements

    # Tiny resident pos_weight pattern: pwm1[0, w] = pos_weights[w % C] - 1.
    pwm1 = jnp.tile(pos_weights.astype(jnp.float32) - 1.0, W // C).reshape(1, W)

    kernel = functools.partial(
        _loss_kernel,
        blocks_per_chunk=blocks_per_chunk,
        block_rows=br,
        row_width=W,
        total_valid=total,
        mask_from_blk=mask_from_blk,
        needs_mask=needs_mask,
        approx_recip=approx_reciprocal,
    )

    # Clamp dead-block indices ourselves; their contribution is masked in-kernel.
    def in_map(p, i):
        return (jnp.minimum(p * blocks_per_chunk + i, n_blocks - 1), 0)

    partials = pl.pallas_call(
        kernel,
        out_shape=jax.ShapeDtypeStruct((n_chunks, 1, W), jnp.float32),
        grid_spec=pltpu.PrefetchScalarGridSpec(
            num_scalar_prefetch=0,
            grid=(n_chunks, blocks_per_chunk),
            in_specs=[
                pl.BlockSpec((br, W), in_map),
                pl.BlockSpec((br, W), in_map),
                pl.BlockSpec((1, W), lambda p, i: (0, 0)),   # pos_weights - 1 (resident)
            ],
            # Per-chunk (1, W) partial-sum block, resident across the inner axis.
            out_specs=pl.BlockSpec((None, 1, W), lambda p, i: (p, 0, 0)),
        ),
        compiler_params=pltpu.CompilerParams(
            dimension_semantics=("parallel", "arbitrary"),
            vmem_limit_bytes=48 * 1024 * 1024,
        ),
    )(pred2, targ2, pwm1)

    # One tiny final reduction + mean in XLA.
    return jnp.sum(partials) / jnp.float32(total)


def _reference_loss(predictions, targets, pos_weights):
    x = predictions.astype(jnp.float32)
    t = targets.astype(jnp.float32)
    pw = pos_weights.astype(jnp.float32)
    softplus_neg_x = jnp.maximum(-x, 0.0) + jnp.log1p(jnp.exp(-jnp.abs(x)))
    bce = (1.0 - t) * x + (1.0 + (pw - 1.0) * t) * softplus_neg_x
    p = jax.nn.sigmoid(x)
    fw = ((1.0 - p) * t + p * (1.0 - t)) ** 2
    return jnp.mean(bce * fw)


if __name__ == "__main__":
    key = jax.random.PRNGKey(0)

    # --- Test 1: small multi-label disease head (batch=16, 14 classes, CheXpert-style).
    #     Exercises the single-block, fully-masked boundary path.
    B, C = 16, 14
    k1, k2, k3 = jax.random.split(key, 3)
    predictions = jax.random.normal(k1, (B, C), dtype=jnp.float32)
    targets = (jax.random.uniform(k2, (B, C)) < 0.3).astype(jnp.float32)
    pos_weights = 0.5 + jax.random.uniform(k3, (C,), dtype=jnp.float32) * 4.0

    loss = jax.block_until_ready(
        disease_classification_loss(predictions, targets, pos_weights))
    ref = jax.block_until_ready(_reference_loss(predictions, targets, pos_weights))
    assert jnp.allclose(loss, ref, rtol=1e-5, atol=1e-5), (loss, ref)

    # --- Test 2: ragged batch with small tiles exercising the multi-block,
    #     2-chunk ("parallel" megacore axis), gated-mask and dead-block paths.
    B2 = 3000
    k4, k5 = jax.random.split(k1)
    predictions2 = jax.random.normal(k4, (B2, C), dtype=jnp.float32)
    targets2 = (jax.random.uniform(k5, (B2, C)) < 0.3).astype(jnp.float32)

    loss2 = jax.block_until_ready(
        disease_classification_loss(predictions2, targets2, pos_weights,
                                    block_rows=16, target_chunks=2))
    ref2 = jax.block_until_ready(_reference_loss(predictions2, targets2, pos_weights))
    assert jnp.allclose(loss2, ref2, rtol=1e-5, atol=1e-5), (loss2, ref2)

    # --- Test 3: aligned batch (B*C a multiple of 8*W) -> copy-free reshape, no mask.
    B3 = 512
    k6, k7 = jax.random.split(k4)
    predictions3 = jax.random.normal(k6, (B3, C), dtype=jnp.float32)
    targets3 = (jax.random.uniform(k7, (B3, C)) < 0.3).astype(jnp.float32)

    loss3 = jax.block_until_ready(
        disease_classification_loss(predictions3, targets3, pos_weights))
    ref3 = jax.block_until_ready(_reference_loss(predictions3, targets3, pos_weights))
    assert jnp.allclose(loss3, ref3, rtol=1e-5, atol=1e-5), (loss3, ref3)

    # --- Test 4: approximate reciprocal path (EUP vrcp) at looser tolerance.
    loss4 = jax.block_until_ready(
        disease_classification_loss(predictions, targets, pos_weights,
                                    approx_reciprocal=True))
    assert jnp.allclose(loss4, ref, rtol=5e-3, atol=5e-3), (loss4, ref)

    print("KERNEL_OK")
</pallas_src>

<mosaic_0001>
module attributes {stable_mosaic.version = 11 : i64} {
  func.func @_loss_kernel(%arg0: i32, %arg1: i32, %arg2: memref<8x896xf32, #tpu.memory_space<vmem>>, %arg3: memref<8x896xf32, #tpu.memory_space<vmem>>, %arg4: memref<1x896xf32, #tpu.memory_space<vmem>>, %arg5: memref<1x1x896xf32, #tpu.memory_space<vmem>>) attributes {dimension_semantics = [#tpu.dimension_semantics<parallel>, #tpu.dimension_semantics<arbitrary>], iteration_bounds = array<i64: 1, 1>, scalar_prefetch = 0 : i64, scratch_operands = 0 : i64, tpu.core_type = #tpu.core_type<tc>, window_params = [{transform_indices = @transform_0, window_bounds = array<i64: 8, 896>}, {transform_indices = @transform_1, window_bounds = array<i64: 8, 896>}, {pipeline_mode = #tpu.pipeline_mode<synchronous>, transform_indices = @transform_2, window_bounds = array<i64: 1, 896>}, {transform_indices = @transform_3, window_bounds = array<i64: 1, 1, 896>}]} {
    %c0_i32 = arith.constant 0 : i32
    %0 = arith.cmpi eq, %arg1, %c0_i32 : i32
    %1 = arith.extui %0 : i1 to i32
    %c0_i32_0 = arith.constant 0 : i32
    %2 = arith.cmpi ne, %1, %c0_i32_0 : i32
    scf.if %2 {
      %cst_19 = arith.constant 0.000000e+00 : f32
      %50 = vector.broadcast %cst_19 : f32 to vector<1x896xf32>
      %c0_20 = arith.constant 0 : index
      %c0_21 = arith.constant 0 : index
      %c0_22 = arith.constant 0 : index
      %51 = vector.load %arg5[%c0_20, %c0_21, %c0_22] : memref<1x1x896xf32, #tpu.memory_space<vmem>>, vector<1x1x896xf32>
      %52 = vector.shape_cast %51 : vector<1x1x896xf32> to vector<1x896xf32>
      %53 = vector.shape_cast %50 : vector<1x896xf32> to vector<1x1x896xf32>
      tpu.vector_store %arg5[%c0_20, %c0_21, %c0_22], %53 {strides = array<i32>} : memref<1x1x896xf32, #tpu.memory_space<vmem>>, vector<1x1x896xf32>,
    } else {
    }
    %c0 = arith.constant 0 : index
    %c0_1 = arith.constant 0 : index
    %3 = vector.load %arg2[%c0, %c0_1] : memref<8x896xf32, #tpu.memory_space<vmem>>, vector<8x896xf32>
    %c0_2 = arith.constant 0 : index
    %c0_3 = arith.constant 0 : index
    %4 = vector.load %arg3[%c0_2, %c0_3] : memref<8x896xf32, #tpu.memory_space<vmem>>, vector<8x896xf32>
    %c0_4 = arith.constant 0 : index
    %c0_5 = arith.constant 0 : index
    %5 = vector.load %arg4[%c0_4, %c0_5] : memref<1x896xf32, #tpu.memory_space<vmem>>, vector<1x896xf32>
    %6 = math.absf %3 : vector<8x896xf32>
    %cst = arith.constant 0.000000e+00 : f32
    %7 = vector.broadcast %cst : f32 to vector<8x896xf32>
    %8 = arith.subf %7, %6 : vector<8x896xf32>
    %9 = math.exp %8 : vector<8x896xf32>
    %cst_6 = arith.constant 0.000000e+00 : f32
    %10 = vector.broadcast %cst_6 : f32 to vector<8x896xf32>
    %11 = arith.subf %10, %3 : vector<8x896xf32>
    %cst_7 = arith.constant 0.000000e+00 : f32
    %12 = vector.broadcast %cst_7 : f32 to vector<8x896xf32>
    %13 = arith.maximumf %11, %12 : vector<8x896xf32>
    %14 = math.log1p %9 : vector<8x896xf32>
    %15 = arith.addf %13, %14 : vector<8x896xf32>
    %cst_8 = arith.constant 1.000000e+00 : f32
    %16 = vector.broadcast %cst_8 : f32 to vector<8x896xf32>
    %17 = arith.subf %16, %4 : vector<8x896xf32>
    %18 = arith.mulf %17, %3 : vector<8x896xf32>
    %19 = vector.broadcast %5 : vector<1x896xf32> to vector<8x896xf32>
    %20 = arith.mulf %19, %4 : vector<8x896xf32>
    %cst_9 = arith.constant 1.000000e+00 : f32
    %21 = vector.broadcast %cst_9 : f32 to vector<8x896xf32>
    %22 = arith.addf %21, %20 : vector<8x896xf32>
    %23 = arith.mulf %22, %15 : vector<8x896xf32>
    %24 = arith.addf %18, %23 : vector<8x896xf32>
    %cst_10 = arith.constant 1.000000e+00 : f32
    %25 = vector.broadcast %cst_10 : f32 to vector<8x896xf32>
    %26 = arith.addf %25, %9 : vector<8x896xf32>
    %cst_11 = arith.constant 1.000000e+00 : f32
    %27 = vector.broadcast %cst_11 : f32 to vector<8x896xf32>
    %28 = arith.divf %27, %26 : vector<8x896xf32>
    %cst_12 = arith.constant 0.000000e+00 : f32
    %29 = vector.broadcast %cst_12 : f32 to vector<8x896xf32>
    %30 = arith.cmpf oge, %3, %29 : vector<8x896xf32>
    %31 = arith.mulf %9, %28 : vector<8x896xf32>
    %32 = arith.select %30, %28, %31 : vector<8x896xi1>, vector<8x896xf32>
    %cst_13 = arith.constant 1.000000e+00 : f32
    %33 = vector.broadcast %cst_13 : f32 to vector<8x896xf32>
    %34 = arith.subf %33, %32 : vector<8x896xf32>
    %35 = arith.mulf %34, %4 : vector<8x896xf32>
    %cst_14 = arith.constant 1.000000e+00 : f32
    %36 = vector.broadcast %cst_14 : f32 to vector<8x896xf32>
    %37 = arith.subf %36, %4 : vector<8x896xf32>
    %38 = arith.mulf %32, %37 : vector<8x896xf32>
    %39 = arith.addf %35, %38 : vector<8x896xf32>
    %40 = arith.mulf %39, %39 : vector<8x896xf32>
    %41 = arith.mulf %24, %40 : vector<8x896xf32>
    %c1_i32 = arith.constant 1 : i32
    %42 = arith.muli %arg0, %c1_i32 : i32
    %43 = arith.addi %42, %arg1 : i32
    %c0_i32_15 = arith.constant 0 : i32
    %44 = arith.cmpi slt, %43, %c0_i32_15 : i32
    %45 = arith.extui %44 : i1 to i32
    %c0_i32_16 = arith.constant 0 : i32
    %46 = arith.cmpi ne, %45, %c0_i32_16 : i32
    scf.if %46 {
      %c0_19 = arith.constant 0 : index
      %c0_20 = arith.constant 0 : index
      %c0_21 = arith.constant 0 : index
      %50 = vector.load %arg5[%c0_19, %c0_20, %c0_21] : memref<1x1x896xf32, #tpu.memory_space<vmem>>, vector<1x1x896xf32>
      %51 = vector.shape_cast %50 : vector<1x1x896xf32> to vector<1x896xf32>
      %cst_22 = arith.constant dense<0.000000e+00> : vector<896xf32>
      %52 = vector.multi_reduction <add>, %41, %cst_22 [0] : vector<8x896xf32> to vector<896xf32>
      %53 = vector.shape_cast %52 : vector<896xf32> to vector<1x896xf32>
      %54 = arith.addf %51, %53 : vector<1x896xf32>
      %c0_23 = arith.constant 0 : index
      %c0_24 = arith.constant 0 : index
      %c0_25 = arith.constant 0 : index
      %55 = vector.load %arg5[%c0_23, %c0_24, %c0_25] : memref<1x1x896xf32, #tpu.memory_space<vmem>>, vector<1x1x896xf32>
      %56 = vector.shape_cast %55 : vector<1x1x896xf32> to vector<1x896xf32>
      %57 = vector.shape_cast %54 : vector<1x896xf32> to vector<1x1x896xf32>
      tpu.vector_store %arg5[%c0_23, %c0_24, %c0_25], %57 {strides = array<i32>} : memref<1x1x896xf32, #tpu.memory_space<vmem>>, vector<1x1x896xf32>,
    } else {
    }
    %c0_i32_17 = arith.constant 0 : i32
    %47 = arith.cmpi sge, %43, %c0_i32_17 : i32
    %48 = arith.extui %47 : i1 to i32
    %c0_i32_18 = arith.constant 0 : i32
    %49 = arith.cmpi ne, %48, %c0_i32_18 : i32
    scf.if %49 {
      %50 = tpu.iota {dimensions = array<i32: 0>} : vector<8x896xi32>
      %51 = tpu.iota {dimensions = array<i32: 1>} : vector<8x896xi32>
      %c8_i32 = arith.constant 8 : i32
      %52 = arith.muli %43, %c8_i32 : i32
      %53 = vector.broadcast %52 : i32 to vector<8x896xi32>
      %54 = arith.addi %53, %50 : vector<8x896xi32>
      %c896_i32 = arith.constant 896 : i32
      %55 = vector.broadcast %c896_i32 : i32 to vector<8x896xi32>
      %56 = arith.muli %54, %55 : vector<8x896xi32>
      %57 = arith.addi %56, %51 : vector<8x896xi32>
      %c224_i32 = arith.constant 224 : i32
      %58 = vector.broadcast %c224_i32 : i32 to vector<8x896xi32>
      %59 = arith.cmpi slt, %57, %58 : vector<8x896xi32>
      %cst_19 = arith.constant 0.000000e+00 : f32
      %60 = vector.broadcast %cst_19 : f32 to vector<8x896xf32>
      %61 = arith.select %59, %41, %60 : vector<8x896xi1>, vector<8x896xf32>
      %c0_20 = arith.constant 0 : index
      %c0_21 = arith.constant 0 : index
      %c0_22 = arith.constant 0 : index
      %62 = vector.load %arg5[%c0_20, %c0_21, %c0_22] : memref<1x1x896xf32, #tpu.memory_space<vmem>>, vector<1x1x896xf32>
      %63 = vector.shape_cast %62 : vector<1x1x896xf32> to vector<1x896xf32>
      %cst_23 = arith.constant dense<0.000000e+00> : vector<896xf32>
      %64 = vector.multi_reduction <add>, %61, %cst_23 [0] : vector<8x896xf32> to vector<896xf32>
      %65 = vector.shape_cast %64 : vector<896xf32> to vector<1x896xf32>
      %66 = arith.addf %63, %65 : vector<1x896xf32>
      %c0_24 = arith.constant 0 : index
      %c0_25 = arith.constant 0 : index
      %c0_26 = arith.constant 0 : index
      %67 = vector.load %arg5[%c0_24, %c0_25, %c0_26] : memref<1x1x896xf32, #tpu.memory_space<vmem>>, vector<1x1x896xf32>
      %68 = vector.shape_cast %67 : vector<1x1x896xf32> to vector<1x896xf32>
      %69 = vector.shape_cast %66 : vector<1x896xf32> to vector<1x1x896xf32>
      tpu.vector_store %arg5[%c0_24, %c0_25, %c0_26], %69 {strides = array<i32>} : memref<1x1x896xf32, #tpu.memory_space<vmem>>, vector<1x1x896xf32>,
    } else {
    }
    return
  }
  func.func @transform_0(%arg0: i32, %arg1: i32) -> (i32, i32) {
    %c1_i32 = arith.constant 1 : i32
    %0 = arith.muli %arg0, %c1_i32 : i32
    %1 = arith.addi %0, %arg1 : i32
    %c0_i32 = arith.constant 0 : i32
    %2 = arith.minsi %1, %c0_i32 : i32
    %c0_i32_0 = arith.constant 0 : i32
    %c0_i32_1 = arith.constant 0 : i32
    return %2, %c0_i32_0 : i32, i32
  }
  func.func @transform_1(%arg0: i32, %arg1: i32) -> (i32, i32) {
    %c1_i32 = arith.constant 1 : i32
    %0 = arith.muli %arg0, %c1_i32 : i32
    %1 = arith.addi %0, %arg1 : i32
    %c0_i32 = arith.constant 0 : i32
    %2 = arith.minsi %1, %c0_i32 : i32
    %c0_i32_0 = arith.constant 0 : i32
    %c0_i32_1 = arith.constant 0 : i32
    return %2, %c0_i32_0 : i32, i32
  }
  func.func @transform_2(%arg0: i32, %arg1: i32) -> (i32, i32) {
    %c0_i32 = arith.constant 0 : i32
    %c0_i32_0 = arith.constant 0 : i32
    %c0_i32_1 = arith.constant 0 : i32
    return %c0_i32, %c0_i32_0 : i32, i32
  }
  func.func @transform_3(%arg0: i32, %arg1: i32) -> (i32, i32, i32) {
    %c0_i32 = arith.constant 0 : i32
    %c0_i32_0 = arith.constant 0 : i32
    %c0_i32_1 = arith.constant 0 : i32
    return %arg0, %c0_i32, %c0_i32_0 : i32, i32, i32
  }
}

</mosaic_0001>

<bundles_post_ra>
// kernel: tpu_custom_call.1
= control target key start
LH: loop header
LB: loop body
LE: loop exit
PB: predicated region body
PF: predicated region fallthrough
CT: control target
= control target key end

     0   :  { %8 = vsyncpa [#allocation3], 0  ;;  %s1199_s0 = inlined_call_operand.hbm [shape: f32[8,896], index: 0, kind: input, shape index: {}]   ;;  %s1200_s1 = inlined_call_operand.hbm [shape: f32[8,896], index: 1, kind: input, shape index: {}]   ;;  %s1201_s2 = inlined_call_operand.vmem [shape: f32[1,896], index: 2, kind: input, shape index: {}]   ;;  %s1202_s3 = inlined_call_operand.hbm [shape: f32[1,1,896], index: 3, kind: output, shape index: {}]  }
   0x1   :  { %9 = vsyncpa [#allocation6], 0 }
   0x2   :  { %10 = vsyncpa [#allocation4], 0  ;;  %s748_s12 = smov [#allocation2]   ;;  %s749_s14 = smov [#allocation5]  }
   0x3   :  { %s23_s13 = sshll.u32 %s748_s12, 4  ;;  %s39_s15 = sshll.u32 %s749_s14, 4  ;;  %s24_s13 = int_to_ptr.vmem [resolvable:$true] %s23_s13  ;;  %s40_s15 = int_to_ptr.vmem [resolvable:$true] %s39_s15 }
   0x4   :  { %s676_s18 = scalar_lea.hbm %s1199_s0, 896 }
   0x5   :  { %p677_p0 = scmp.ne.s32.totalorder %s1199_s0, %s676_s18  ;;  %p680_p1 = scmp.lt.u32.totalorder %s676_s18, %s1199_s0 }
   0x7   :  { %p682_p2 = pnand %p680_p1, %p677_p0 }
   0x9   :  { %685 = shalt.err (!%p682_p2)
}
   0xa   :  { %s686_s23 = scalar_lea.vmem %s24_s13, 896  ;;  %p691_p4 = scmp.lt.s32.totalorder %s24_s13, %s24_s13 }
   0xb   :  { %p687_p3 = scmp.ne.s32.totalorder %s24_s13, %s686_s23  ;;  %p692_p5 = scmp.lt.s32.totalorder %s686_s23, %s686_s23 }
   0xd   :  { %p693_p6 = por %p692_p5, %p691_p4 }
   0xf   :  { %p694_p7 = pnand %p693_p6, %p687_p3 }
  0x11   :  { %697 = shalt.err (!%p694_p7)
}
  0x12   :  { %26 = dma.hbm_to_vmem [thread:$0]  %s1199_s0, 896, %s24_s13, [#allocation3]  }
  0x13   :  { %s698_s28 = scalar_lea.hbm %s1200_s1, 896 }
  0x14   :  { %p699_p8 = scmp.ne.s32.totalorder %s1200_s1, %s698_s28  ;;  %p702_p9 = scmp.lt.u32.totalorder %s698_s28, %s1200_s1 }
  0x16   :  { %p704_p10 = pnand %p702_p9, %p699_p8 }
  0x18   :  { %707 = shalt.err (!%p704_p10)
}
  0x19   :  { %s708_s6 = scalar_lea.vmem %s40_s15, 896  ;;  %p713_p12 = scmp.lt.s32.totalorder %s40_s15, %s40_s15 }
  0x1a   :  { %p709_p11 = scmp.ne.s32.totalorder %s40_s15, %s708_s6  ;;  %p714_p13 = scmp.lt.s32.totalorder %s708_s6, %s708_s6 }
  0x1c   :  { %p715_p0 = por %p714_p13, %p713_p12 }
  0x1e   :  { %p716_p1 = pnand %p715_p0, %p709_p11 }
  0x20   :  { %719 = shalt.err (!%p716_p1)
}
  0x21   :  { %42 = dma.hbm_to_vmem [thread:$0]  %s1200_s1, 896, %s40_s15, [#allocation6]  }
  0x22   :  { %742 = dma.done.wait [#allocation3], 896  }
  0x23   :  { %743 = vsyncadd [#allocation3], 4294966400 }
  0x24   :  { %744 = dma.done.wait [#allocation6], 896  }
  0x25   :  { %745 = vsyncadd [#allocation6], 4294966400  ;;  %v61_v0 = vlaneseq  ;;  %v1233_v1 = vmov 0  ;;  %v750_v3 = vmov 0.0   ;;  %v809_v9 = vld [vmem:[#allocation2] sm:$0xff]  ;;  %v811_v10 = vld [vmem:[#allocation2 + $0x8] sm:$0xff] }
  0x26   :  { %v813_v11 = vld [vmem:[#allocation2 + $0x10] sm:$0xff]  ;;  %v818_v15 = vld [vmem:[#allocation2 + $0x18] sm:$0xff]  ;;  %v81_v16 = vand.u32 2147483647, %v809_v9  ;;  %v821_v20 = vld [vmem:[#allocation2 + $0x20] sm:$0xff]  ;;  %v109_v31 = vsub.f32 0.0, %v809_v9 }
  0x27   :  { %vm797_vm0 = vcmp.lt.s32.totalorder %v61_v0, 896  ;;  %v801_v2 = vshrl.u32 %v61_v0, 7  ;;  %v472_v4 = vand.u32 127, %v61_v0  ;;  %1237 = vst [vmem:[#allocation13_spill] sm:$0xff] %v818_v15  ;;  %1238 = vst [vmem:[#allocation14_spill] sm:$0xff] %v821_v20  ;;  %v823_v21 = vld [vmem:[#allocation2 + $0x28] sm:$0xff] }
  0x28   :  { %v1234_v1 = vsel %vm797_vm0, 4294967295, %v1233_v1  ;;  %65 = vst.msk [vmem:[#allocation7] sm:$0x7f] %vm797_vm0, %v750_v3  ;;  %v825_v22 = vld [vmem:[#allocation2 + $0x30] sm:$0xff]  ;;  %v82_v23 = vand.u32 2147483647, %v811_v10 }
  0x29   :  { %1235 = vst [vmem:[#allocation11_spill] sm:$0xff] %v1234_v1  ;;  %1236 = vst [vmem:[#allocation12_spill] sm:$0xff] %v801_v2  ;;  %v210_v5 = vsub.s32 0, %v801_v2  ;;  %v214_v6 = vsub.s32 1, %v801_v2  ;;  %v218_v7 = vsub.s32 2, %v801_v2  ;;  %v222_v8 = vsub.s32 3, %v801_v2 }
  0x2a   :  { %v226_v12 = vsub.s32 4, %v801_v2  ;;  %v230_v13 = vsub.s32 5, %v801_v2  ;;  %v234_v14 = vsub.s32 6, %v801_v2  ;;  %v473_v17 = vadd.s32 128, %v472_v4  ;;  %v850_v50 = vld [vmem:[%s1201_s2] sm:$0xff]  ;;  %v858_v57 = vld [vmem:[#allocation5] sm:$0xff] }
  0x2b   :  { %v474_v18 = vadd.s32 256, %v472_v4  ;;  %v475_v19 = vadd.s32 384, %v472_v4  ;;  %v476_v24 = vadd.s32 512, %v472_v4  ;;  %v83_v25 = vand.u32 2147483647, %v813_v11  ;;  %1244 = vst [vmem:[#allocation20_spill] sm:$0xff] %v858_v57 }
  0x2c   :  { %v88_v26 = vsub.f32 0.0, %v81_v16  ;;  %v477_v27 = vadd.s32 640, %v472_v4  ;;  %v829_v28 = vadd.s32 768, %v472_v4  ;;  %v84_v29 = vand.u32 2147483647, %v818_v15  ;;  %v860_v58 = vld [vmem:[#allocation5 + $0x8] sm:$0xff] }
  0x2d   :  { %v89_v30 = vsub.f32 0.0, %v82_v23  ;;  %v834_v32 = vmul.u32 896, %v801_v2  ;;  %v85_v33 = vand.u32 2147483647, %v821_v20  ;;  %v86_v34 = vand.u32 2147483647, %v823_v21 }
  0x2e   :  { %1239 = vst [vmem:[#allocation15_spill] sm:$0xff] %v829_v28  ;;  %v87_v35 = vand.u32 2147483647, %v825_v22  ;;  %v90_v36 = vsub.f32 0.0, %v83_v25  ;;  %v91_v37 = vsub.f32 0.0, %v84_v29  ;;  %v110_v43 = vsub.f32 0.0, %v811_v10 }
  0x2f   :  { %1240 = vst [vmem:[#allocation16_spill] sm:$0xff] %v834_v32  ;;  %v95_v38 = vmul.f32 1.442695, %v88_v26  ;;  %v97_v39 = vmul.f32 1.442695, %v89_v30  ;;  %v92_v40 = vsub.f32 0.0, %v85_v33  ;;  %v841_v46 = vadd.s32 %v834_v32, %v472_v4 }
  0x30   :  { %v93_v41 = vsub.f32 0.0, %v86_v34  ;;  %v94_v42 = vsub.f32 0.0, %v87_v35  ;;  %v99_v44 = vmul.f32 1.442695, %v90_v36  ;;  %v101_v45 = vmul.f32 1.442695, %v91_v37 }
  0x31   :  { %634 = vpow2.f32 %v95_v38  ;;  %1241 = vst [vmem:[#allocation17_spill] sm:$0xff] %v841_v46  ;;  %v103_v47 = vmul.f32 1.442695, %v92_v40  ;;  %v111_v48 = vsub.f32 0.0, %v813_v11  ;;  %v845_v49 = vadd.s32 %v834_v32, %v473_v17  ;;  %1245 = vst [vmem:[#allocation21_spill] sm:$0xff] %v860_v58  ;;  %v869_v62 = vld [vmem:[#allocation5 + $0x10] sm:$0xff] }
  0x32   :  { %636 = vpow2.f32 %v97_v39  ;;  %v105_v51 = vmul.f32 1.442695, %v93_v41  ;;  %v112_v52 = vsub.f32 0.0, %v818_v15  ;;  %v113_v53 = vsub.f32 0.0, %v821_v20  ;;  %1248 = vst [vmem:[#allocation24_spill] sm:$0xff] %v869_v62  ;;  %v871_v63 = vld [vmem:[#allocation5 + $0x18] sm:$0xff] }
  0x33   :  { %1242 = vst [vmem:[#allocation18_spill] sm:$0xff] %v845_v49  ;;  %638 = vpow2.f32 %v99_v44  ;;  %v107_v54 = vmul.f32 1.442695, %v94_v42  ;;  %v114_v55 = vsub.f32 0.0, %v823_v21  ;;  %v856_v56 = vadd.s32 %v834_v32, %v474_v18  ;;  %1249 = vst [vmem:[#allocation25_spill] sm:$0xff] %v871_v63  ;;  %v873_v0 = vld [vmem:[#allocation5 + $0x20] sm:$0xff] }
  0x34   :  { %640 = vpow2.f32 %v101_v45  ;;  %v115_v59 = vsub.f32 0.0, %v825_v22  ;;  %v864_v60 = vadd.s32 %v834_v32, %v475_v19  ;;  %v867_v61 = vadd.s32 %v834_v32, %v476_v24  ;;  %v885_v18 = vld [vmem:[#allocation5 + $0x28] sm:$0xff]  ;;  %v887_v19 = vld [vmem:[#allocation5 + $0x30] sm:$0xff]  ;;  %s752_s2 = smov [#allocation7]  }
  0x35   :  { %1243 = vst [vmem:[#allocation19_spill] sm:$0xff] %v856_v56  ;;  %642 = vpow2.f32 %v103_v47  ;;  %v875_v3 = vmax.f32 %v109_v31, 0.0  ;;  %v877_v4 = vmax.f32 %v110_v43, 0.0  ;;  %v211_v16 = vrot.slane %v850_v50, %v210_v5  ;;  %s615_s9 = sshll.u32 %s752_s2, 4  ;;  %s616_s9 = int_to_ptr.vmem [resolvable:$true] %s615_s9 }
  0x36   :  { %1246 = vst [vmem:[#allocation22_spill] sm:$0xff] %v864_v60  ;;  %1247 = vst [vmem:[#allocation23_spill] sm:$0xff] %v867_v61  ;;  %v883_v17 = vadd.s32 %v834_v32, %v477_v27  ;;  %644 = vpow2.f32 %v105_v51  ;;  %v889_v23 = vmax.f32 %v111_v48, 0.0  ;;  %v891_v24 = vmax.f32 %v112_v52, 0.0  ;;  %s720_s10 = scalar_lea.vmem %s616_s9, 112  ;;  %s724_s11 = scalar_lea.vmem %s616_s9, 128 }
  0x37   :  { %v893_v25 = vmax.f32 %v113_v53, 0.0  ;;  %646 = vpow2.f32 %v107_v54  ;;  %v895_v26 = vmax.f32 %v114_v55, 0.0  ;;  %v1207_v29 = vsub.f32 1.0, %v858_v57  ;;  %p721_p2 = scmp.ne.s32.totalorder %s616_s9, %s720_s10  ;;  %p725_p3 = scmp.lt.s32.totalorder %s616_s9, %s616_s9 }
  0x38   :  { %1250 = vst [vmem:[#allocation26_spill] sm:$0xff] %v883_v17  ;;  %v1206_v5 = vsub.f32 1.0, %v860_v58  ;;  %v899_v27 = vmax.f32 %v115_v59, 0.0  ;;  %v1205_v30 = vsub.f32 1.0, %v869_v62  ;;  %v1204_v31 = vsub.f32 1.0, %v871_v63  ;;  %p726_p4 = scmp.lt.s32.totalorder %s724_s11, %s720_s10 }
  0x39   :  { %v1203_v33 = vsub.f32 1.0, %v873_v0  ;;  %v909_v36 = vmul.f32 %v1207_v29, %v809_v9  ;;  %v215_v42 = vrot.slane %v850_v50, %v214_v6  ;;  %v219_v45 = vrot.slane %v850_v50, %v218_v7 }
  0x3a   :  { %v914_v37 = vmul.f32 %v1206_v5, %v811_v10  ;;  %v921_v39 = vmul.f32 %v1205_v30, %v813_v11  ;;  %v926_v40 = vmul.f32 %v1204_v31, %v818_v15  ;;  %v223_v47 = vrot.slane %v850_v50, %v222_v8  ;;  %p727_p5 = por %p726_p4, %p725_p3 }
  0x3b   :  { %v916_v38 = vpop.eup %634  ;;  %v931_v41 = vmul.f32 %v1203_v33, %v821_v20  ;;  %v950_v48 = vrot.slane %v850_v50, %v226_v12  ;;  %v231_v55 = vrot.slane %v850_v50, %v230_v13  ;;  %v235_v31 = vrot.slane %v850_v50, %v234_v14 }
  0x3c   :  { %1251 = vst [vmem:[#allocation27_spill] sm:$0xff] %v916_v38  ;;  %v936_v43 = vpop.eup %636  ;;  %v939_v44 = vadd.f32 1.0, %v916_v38  ;;  %v126_v6 = vmul.f32 -0.5, %v916_v38  ;;  %v129_v52 = vand.u32 2147483647, %v916_v38  ;;  %v243_v30 = vmul.f32 %v211_v16, %v858_v57  ;;  %p728_p6 = pnand %p727_p5, %p721_p2 }
  0x3d   :  { %1252 = vst [vmem:[#allocation28_spill] sm:$0xff] %v936_v43  ;;  %v952_v51 = vpop.eup %638  ;;  %v957_v53 = vadd.f32 1.0, %v936_v43  ;;  %v135_v7 = vmul.f32 -0.5, %v936_v43  ;;  %v138_v8 = vand.u32 2147483647, %v936_v43  ;;  %v244_v29 = vmul.f32 %v215_v42, %v860_v58 }
  0x3e   :  { %1253 = vst [vmem:[#allocation29_spill] sm:$0xff] %v952_v51  ;;  %v960_v54 = vpop.eup %640  ;;  %648 = vlog2.f32 %v939_v44  ;;  %v965_v12 = vadd.f32 1.0, %v952_v51  ;;  %v144_v33 = vmul.f32 -0.5, %v952_v51  ;;  %v245_v13 = vmul.f32 %v219_v45, %v869_v62 }
  0x3f   :  { %1254 = vst [vmem:[#allocation30_spill] sm:$0xff] %v960_v54  ;;  %v970_v59 = vpop.eup %642  ;;  %650 = vlog2.f32 %v957_v53  ;;  %v980_v5 = vadd.f32 1.0, %v960_v54  ;;  %v127_v34 = vadd.f32 1.0, %v126_v6  ;;  %vm986_vm1 = vcmp.lt.f32.partialorder %v129_v52, 0.0004427343 }
  0x40   :  { %652 = vlog2.f32 %v965_v12  ;;  %v984_v35 = vpop.eup %644  ;;  %v136_v2 = vadd.f32 1.0, %v135_v7  ;;  %v153_v14 = vmul.f32 -0.5, %v960_v54  ;;  %vm993_vm2 = vcmp.lt.f32.partialorder %v138_v8, 0.0004427343 }
  0x41   :  { %v991_v50 = vpop.eup %646  ;;  %654 = vlog2.f32 %v980_v5  ;;  %v999_v42 = vadd.f32 1.0, %v970_v59  ;;  %v162_v45 = vmul.f32 -0.5, %v970_v59  ;;  %v145_v6 = vadd.f32 1.0, %v144_v33 }
  0x42   :  { %v147_v52 = vand.u32 2147483647, %v952_v51  ;;  %v154_v17 = vadd.f32 1.0, %v153_v14  ;;  %v156_v7 = vand.u32 2147483647, %v960_v54  ;;  %v1007_v61 = vadd.f32 1.0, %v984_v35 }
  0x43   :  { %656 = vlog2.f32 %v999_v42  ;;  %v165_v8 = vand.u32 2147483647, %v970_v59  ;;  %v171_v60 = vmul.f32 -0.5, %v984_v35  ;;  %v128_v56 = vmul.f32 %v916_v38, %v127_v34 }
  0x44   :  { %v163_v49 = vadd.f32 1.0, %v162_v45  ;;  %v174_v62 = vand.u32 2147483647, %v984_v35  ;;  %v1013_v33 = vadd.f32 1.0, %v991_v50  ;;  %v137_v14 = vmul.f32 %v936_v43, %v136_v2 }
  0x45   :  { %658 = vlog2.f32 %v1007_v61  ;;  %v172_v58 = vadd.f32 1.0, %v171_v60  ;;  %v180_v46 = vmul.f32 -0.5, %v991_v50  ;;  %v146_v57 = vmul.f32 %v952_v51, %v145_v6 }
  0x46   :  { %vm1019_vm3 = vcmp.lt.f32.partialorder %v147_v52, 0.0004427343  ;;  %660 = vlog2.f32 %v1013_v33  ;;  %v183_v34 = vand.u32 2147483647, %v991_v50  ;;  %v155_v28 = vmul.f32 %v960_v54, %v154_v17 }
  0x47   :  { %vm1026_vm4 = vcmp.lt.f32.partialorder %v156_v7, 0.0004427343  ;;  %vm1030_vm5 = vcmp.lt.f32.partialorder %v165_v8, 0.0004427343  ;;  %v181_v6 = vadd.f32 1.0, %v180_v46  ;;  %v164_v43 = vmul.f32 %v970_v59, %v163_v49  ;;  %v1273_v49 = vld [vmem:[#allocation27_spill] sm:$0xff] }
  0x48   :  { %v649_v45 = vpop.eup %648  ;;  %vm1035_vm6 = vcmp.lt.f32.partialorder %v174_v62, 0.0004427343  ;;  %v246_v20 = vmul.f32 %v223_v47, %v871_v63  ;;  %v173_v54 = vmul.f32 %v984_v35, %v172_v58  ;;  %v247_v8 = vmul.f32 %v950_v48, %v873_v0 }
  0x49   :  { %v651_v52 = vpop.eup %650  ;;  %v125_v51 = vmul.f32 0.6931472, %v649_v45  ;;  %v248_v15 = vmul.f32 %v231_v55, %v885_v18  ;;  %vm1046_vm7 = vcmp.lt.f32.partialorder %v183_v34, 0.0004427343  ;;  %v249_v62 = vmul.f32 %v235_v31, %v887_v19 }
  0x4a   :  { %v653_v17 = vpop.eup %652  ;;  %v134_v7 = vmul.f32 0.6931472, %v651_v52  ;;  %v182_v58 = vmul.f32 %v991_v50, %v181_v6  ;;  %v250_v63 = vadd.f32 1.0, %v243_v30  ;;  %v251_v48 = vadd.f32 1.0, %v244_v29 }
  0x4b   :  { %v131_v46 = vsel %vm986_vm1, %v128_v56, %v125_v51  ;;  %v143_v45 = vmul.f32 0.6931472, %v653_v17  ;;  %v655_v47 = vpop.eup %654  ;;  %662 = vrcp.f32 %v939_v44  ;;  %v252_v17 = vadd.f32 1.0, %v245_v13 }
  0x4c   :  { %v140_v52 = vsel %vm993_vm2, %v137_v14, %v134_v7  ;;  %v152_v1 = vmul.f32 0.6931472, %v655_v47  ;;  %v186_v56 = vadd.f32 %v131_v46, %v875_v3  ;;  %664 = vrcp.f32 %v957_v53 }
  0x4d   :  { %v149_v55 = vsel %vm1019_vm3, %v146_v57, %v143_v45  ;;  %v657_v51 = vpop.eup %656  ;;  %v187_v34 = vadd.f32 %v140_v52, %v877_v4  ;;  %v253_v16 = vadd.f32 1.0, %v246_v20  ;;  %666 = vrcp.f32 %v965_v12  ;;  %v1275_v52 = vld [vmem:[#allocation15_spill] sm:$0xff] }
  0x4e   :  { %v188_v31 = vadd.f32 %v149_v55, %v889_v23  ;;  %v158_v30 = vsel %vm1026_vm4, %v155_v28, %v152_v1  ;;  %v161_v29 = vmul.f32 0.6931472, %v657_v51  ;;  %v254_v3 = vadd.f32 1.0, %v247_v8 }
  0x4f   :  { %v659_v32 = vpop.eup %658  ;;  %v189_v57 = vadd.f32 %v158_v30, %v891_v24  ;;  %v255_v44 = vadd.f32 1.0, %v248_v15  ;;  %668 = vrcp.f32 %v980_v5  ;;  %v257_v53 = vmul.f32 %v250_v63, %v186_v56  ;;  %v1277_v56 = vld [vmem:[#allocation29_spill] sm:$0xff] }
  0x50   :  { %v661_v4 = vpop.eup %660  ;;  %v167_v23 = vsel %vm1030_vm5, %v164_v43, %v161_v29  ;;  %v170_v13 = vmul.f32 0.6931472, %v659_v32  ;;  %670 = vrcp.f32 %v999_v42  ;;  %v258_v14 = vmul.f32 %v251_v48, %v187_v34  ;;  %v1279_v32 = vld [vmem:[#allocation20_spill] sm:$0xff] }
  0x51   :  { %v179_v28 = vmul.f32 0.6931472, %v661_v4  ;;  %v190_v20 = vadd.f32 %v167_v23, %v893_v25  ;;  %v259_v12 = vmul.f32 %v252_v17, %v188_v31  ;;  %v256_v2 = vadd.f32 1.0, %v249_v62  ;;  %v1278_v17 = vld [vmem:[#allocation30_spill] sm:$0xff] }
  0x52   :  { %v176_v24 = vsel %vm1035_vm6, %v173_v54, %v170_v13  ;;  %v260_v15 = vmul.f32 %v253_v16, %v189_v57  ;;  %672 = vrcp.f32 %v1007_v61  ;;  %v1269_v63 = vsub.f32 1.0, %v885_v18 }
  0x53   :  { %v185_v5 = vsel %vm1046_vm7, %v182_v58, %v179_v28  ;;  %v191_v43 = vadd.f32 %v176_v24, %v895_v26  ;;  %v261_v60 = vmul.f32 %v254_v3, %v190_v20  ;;  %v1270_v38 = vsub.f32 1.0, %v887_v19  ;;  %v1276_v58 = vld [vmem:[#allocation16_spill] sm:$0xff] }
  0x54   :  { %v205_v42 = vmul.f32 %v1269_v63, %v823_v21  ;;  %v192_v25 = vadd.f32 %v185_v5, %v899_v27  ;;  %674 = vrcp.f32 %v1013_v33  ;;  %vm292_vm8 = vcmp.ge.f32.partialorder %v809_v9, 0.0  ;;  %v1282_v9 = vld [vmem:[#allocation21_spill] sm:$0xff]  ;;  %v1284_v24 = vld [vmem:[#allocation24_spill] sm:$0xff]  ;;  %v1286_v5 = vld [vmem:[#allocation18_spill] sm:$0xff] }
  0x55   :  { %v206_v54 = vmul.f32 %v1270_v38, %v825_v22  ;;  %v262_v61 = vmul.f32 %v255_v44, %v191_v43  ;;  %v1086_v6 = vadd.f32 %v257_v53, %v909_v36  ;;  %v1089_v26 = vadd.f32 %v258_v14, %v914_v37  ;;  %v663_v8 = vpop.eup %662  ;;  %v1271_v36 = vld [vmem:[#allocation13_spill] sm:$0xff]  ;;  %v1272_v37 = vld [vmem:[#allocation14_spill] sm:$0xff] }
  0x56   :  { %v1092_v7 = vadd.f32 %v259_v12, %v921_v39  ;;  %v263_v27 = vmul.f32 %v256_v2, %v192_v25  ;;  %v1095_v46 = vadd.f32 %v260_v15, %v926_v40  ;;  %vm293_vm9 = vcmp.ge.f32.partialorder %v811_v10, 0.0  ;;  %v665_v33 = vpop.eup %664  ;;  %v1274_v40 = vld [vmem:[#allocation28_spill] sm:$0xff]  ;;  %v1281_v44 = vld [vmem:[#allocation17_spill] sm:$0xff]  ;;  %v1289_v25 = vld [vmem:[#allocation23_spill] sm:$0xff] }
  0x57   :  { %vm294_vm10 = vcmp.ge.f32.partialorder %v813_v11, 0.0  ;;  %v1100_v45 = vadd.f32 %v261_v60, %v931_v41  ;;  %vm295_vm11 = vcmp.ge.f32.partialorder %v1271_v36, 0.0  ;;  %vm296_vm12 = vcmp.ge.f32.partialorder %v1272_v37, 0.0  ;;  %v667_v62 = vpop.eup %666  ;;  %v1288_v11 = vld [vmem:[#allocation22_spill] sm:$0xff] }
  0x58   :  { %v299_v39 = vmul.f32 %v663_v8, %v1273_v49  ;;  %vm297_vm13 = vcmp.ge.f32.partialorder %v823_v21, 0.0  ;;  %vm298_vm14 = vcmp.ge.f32.partialorder %v825_v22, 0.0  ;;  %v300_v47 = vmul.f32 %v665_v33, %v1274_v40 }
  0x59   :  { %v1110_v48 = vadd.s32 %v1276_v58, %v1275_v52  ;;  %v669_v55 = vpop.eup %668  ;;  %v1112_v41 = vadd.f32 %v262_v61, %v205_v42  ;;  %v1114_v1 = vadd.f32 %v263_v27, %v206_v54  ;;  %v301_v51 = vmul.f32 %v667_v62, %v1277_v56 }
  0x5a   :  { %v306_v34 = vsel %vm292_vm8, %v663_v8, %v299_v39  ;;  %v671_v31 = vpop.eup %670  ;;  %v302_v30 = vmul.f32 %v669_v55, %v1278_v17  ;;  %v307_v29 = vsel %vm293_vm9, %v665_v33, %v300_v47  ;;  %v1280_v57 = vsub.f32 1.0, %v1279_v32  ;;  %v1290_v8 = vld [vmem:[#allocation25_spill] sm:$0xff] }
  0x5b   :  { %v313_v16 = vsub.f32 1.0, %v306_v34  ;;  %vm490_vm15 = vcmp.lt.s32.totalorder %v1281_v44, 224  ;;  %v303_v4 = vmul.f32 %v671_v31, %v970_v59  ;;  %v308_v23 = vsel %vm294_vm10, %v667_v62, %v301_v51  ;;  %v1287_v59 = vld [vmem:[#allocation19_spill] sm:$0xff] }
  0x5c   :  { %v327_v3 = vmul.f32 %v306_v34, %v1280_v57  ;;  %v314_v13 = vsub.f32 1.0, %v307_v29  ;;  %v1283_v53 = vsub.f32 1.0, %v1282_v9  ;;  %v673_v20 = vpop.eup %672  ;;  %v309_v10 = vsel %vm295_vm11, %v669_v55, %v302_v30 }
  0x5d   :  { %v315_v14 = vsub.f32 1.0, %v308_v23  ;;  %v320_v12 = vmul.f32 %v313_v16, %v1279_v32  ;;  %v1285_v2 = vsub.f32 1.0, %v1284_v24  ;;  %vm491_vm1 = vcmp.lt.s32.totalorder %v1286_v5, 224 }
  0x5e   :  { %v328_v28 = vmul.f32 %v307_v29, %v1283_v53  ;;  %vm492_vm2 = vcmp.lt.s32.totalorder %v1287_v59, 224  ;;  %vm493_vm3 = vcmp.lt.s32.totalorder %v1288_v11, 224  ;;  %v304_v43 = vmul.f32 %v673_v20, %v984_v35  ;;  %v675_v38 = vpop.eup %674 }
  0x5f   :  { %v329_v15 = vmul.f32 %v308_v23, %v1285_v2  ;;  %v310_v63 = vsel %vm296_vm12, %v671_v31, %v303_v4  ;;  %v316_v42 = vsub.f32 1.0, %v309_v10  ;;  %v321_v60 = vmul.f32 %v314_v13, %v1282_v9  ;;  %v1295_v23 = vld [vmem:[#allocation26_spill] sm:$0xff] }
  0x60   :  { %vm494_vm4 = vcmp.lt.s32.totalorder %v1289_v25, 224  ;;  %v317_v54 = vsub.f32 1.0, %v310_v63  ;;  %v322_v61 = vmul.f32 %v315_v14, %v1284_v24  ;;  %v1291_v27 = vsub.f32 1.0, %v1290_v8 }
  0x61   :  { %v1292_v36 = vsub.f32 1.0, %v873_v0  ;;  %v305_v35 = vmul.f32 %v675_v38, %v991_v50  ;;  %v311_v37 = vsel %vm297_vm13, %v673_v20, %v304_v43  ;;  %v323_v39 = vmul.f32 %v316_v42, %v1290_v8 }
  0x62   :  { %v330_v33 = vmul.f32 %v309_v10, %v1291_v27  ;;  %v334_v62 = vadd.f32 %v327_v3, %v320_v12  ;;  %v318_v40 = vsub.f32 1.0, %v311_v37  ;;  %v324_v47 = vmul.f32 %v317_v54, %v873_v0 }
  0x63   :  { %v331_v49 = vmul.f32 %v310_v63, %v1292_v36  ;;  %v1293_v52 = vsub.f32 1.0, %v885_v18  ;;  %v335_v55 = vadd.f32 %v328_v28, %v321_v60  ;;  %v312_v56 = vsel %vm298_vm14, %v675_v38, %v305_v35 }
  0x64   :  { %v336_v51 = vadd.f32 %v329_v15, %v322_v61  ;;  %v337_v34 = vadd.f32 %v330_v33, %v323_v39  ;;  %v341_v31 = vmul.f32 %v334_v62, %v334_v62  ;;  %v319_v50 = vsub.f32 1.0, %v312_v56 }
  0x65   :  { %v332_v58 = vmul.f32 %v311_v37, %v1293_v52  ;;  %v325_v21 = vmul.f32 %v318_v40, %v885_v18  ;;  %v1294_v17 = vsub.f32 1.0, %v887_v19  ;;  %v338_v29 = vadd.f32 %v331_v49, %v324_v47 }
  0x66   :  { %v342_v16 = vmul.f32 %v335_v55, %v335_v55  ;;  %v343_v32 = vmul.f32 %v336_v51, %v336_v51  ;;  %v344_v0 = vmul.f32 %v337_v34, %v337_v34  ;;  %v348_v57 = vmul.f32 %v341_v31, %v1086_v6 }
  0x67   :  { %v333_v30 = vmul.f32 %v312_v56, %v1294_v17  ;;  %v326_v3 = vmul.f32 %v319_v50, %v887_v19  ;;  %v339_v4 = vadd.f32 %v332_v58, %v325_v21  ;;  %v345_v22 = vmul.f32 %v338_v29, %v338_v29  ;;  %v1296_v29 = vld [vmem:[#allocation12_spill] sm:$0xff] }
  0x68   :  { %vm495_vm5 = vcmp.lt.s32.totalorder %v1295_v23, 224  ;;  %v349_v13 = vmul.f32 %v342_v16, %v1089_v26  ;;  %v350_v9 = vmul.f32 %v343_v32, %v1092_v7  ;;  %v351_v18 = vmul.f32 %v344_v0, %v1095_v46 }
  0x69   :  { %v497_v53 = vsel %vm490_vm15, %v348_v57, 0.0  ;;  %v340_v28 = vadd.f32 %v333_v30, %v326_v3  ;;  %v346_v20 = vmul.f32 %v339_v4, %v339_v4  ;;  %v352_v10 = vmul.f32 %v345_v22, %v1100_v45 }
  0x6a   :  { %v505_v6 = vrot.slane %v497_v53, 4  ;;  %vm496_vm6 = vcmp.lt.s32.totalorder %v1110_v48, 224  ;;  %v498_v19 = vsel %vm491_vm1, %v349_v13, 0.0  ;;  %v499_v26 = vsel %vm492_vm2, %v350_v9, 0.0 }
  0x6b   :  { %v500_v7 = vsel %vm493_vm3, %v351_v18, 0.0  ;;  %v347_v46 = vmul.f32 %v340_v28, %v340_v28  ;;  %v353_v44 = vmul.f32 %v346_v20, %v1112_v41  ;;  %v501_v14 = vsel %vm494_vm4, %v352_v10, 0.0 }
  0x6c   :  { %v506_v12 = vadd.f32 %v505_v6, %v497_v53  ;;  %v511_v45 = vrot.slane %v498_v19, 4  ;;  %v517_v24 = vrot.slane %v499_v26, 4  ;;  %v523_v2 = vrot.slane %v500_v7, 4 }
  0x6d   :  { %v529_v15 = vrot.slane %v501_v14, 4  ;;  %v354_v5 = vmul.f32 %v347_v46, %v1114_v1  ;;  %v502_v59 = vsel %vm495_vm5, %v353_v44, 0.0  ;;  %v751_v63 = vmov 1966171168  }
  0x6e   :  { %v507_v43 = vrot.slane %v506_v12, 2  ;;  %v558_v11 = vunpack.c.l.s4 %v751_v63  ;;  %v512_v42 = vadd.f32 %v511_v45, %v498_v19  ;;  %v518_v60 = vadd.f32 %v517_v24, %v499_v26 }
  0x6f   :  { %v524_v38 = vadd.f32 %v523_v2, %v500_v7  ;;  %v530_v41 = vadd.f32 %v529_v15, %v501_v14  ;;  %v503_v25 = vsel %vm496_vm6, %v354_v5, 0.0  ;;  %v535_v61 = vrot.slane %v502_v59, 4  ;;  %v504_v7 = vld [vmem:[#allocation7] sm:$0xff] }
  0x70   :  { %v508_v54 = vadd.f32 %v507_v43, %v506_v12  ;;  %v513_v8 = vrot.slane %v512_v42, 2  ;;  %v519_v27 = vrot.slane %v518_v60, 2  ;;  %v541_v35 = vrot.slane %v503_v25, 4 }
  0x71   :  { %v525_v33 = vrot.slane %v524_v38, 2  ;;  %v531_v36 = vrot.slane %v530_v41, 2  ;;  %v536_v49 = vadd.f32 %v535_v61, %v502_v59  ;;  %v559_v37 = vunpack.c.0.s8 %v558_v11 }
  0x72   :  { %v509_v1 = vrot.slane %v508_v54, 1  ;;  %v514_v39 = vadd.f32 %v513_v8, %v512_v42  ;;  %v520_v62 = vadd.f32 %v519_v27, %v518_v60  ;;  %v542_v55 = vadd.f32 %v541_v35, %v503_v25 }
  0x73   :  { %v526_v40 = vadd.f32 %v525_v33, %v524_v38  ;;  %v532_v47 = vadd.f32 %v531_v36, %v530_v41  ;;  %v537_v58 = vrot.slane %v536_v49, 2  ;;  %v562_v16 = vsub.s32 %v559_v37, %v1296_v29 }
  0x74   :  { %v510_v52 = vadd.f32 %v509_v1, %v508_v54  ;;  %v515_v56 = vrot.slane %v514_v39, 1  ;;  %v521_v48 = vrot.slane %v520_v62, 1  ;;  %v543_v50 = vrot.slane %v542_v55, 2 }
  0x75   :  { %v527_v51 = vrot.slane %v526_v40, 1  ;;  %v533_v34 = vrot.slane %v532_v47, 1  ;;  %v538_v31 = vadd.f32 %v537_v58, %v536_v49 }
  0x76   :  { %v516_v21 = vadd.f32 %v515_v56, %v514_v39  ;;  %v522_v17 = vadd.f32 %v521_v48, %v520_v62  ;;  %v544_v57 = vadd.f32 %v543_v50, %v542_v55 }
  0x77   :  { %v528_v30 = vadd.f32 %v527_v51, %v526_v40  ;;  %v534_v32 = vadd.f32 %v533_v34, %v532_v47  ;;  %v539_v0 = vrot.slane %v538_v31, 1 }
  0x78   :  { %v554_v3 = vcombine.low %v510_v52, %v516_v21  ;;  %v545_v23 = vrot.slane %v544_v57, 1 }
  0x79   :  { %v555_v4 = vcombine.low %v522_v17, %v528_v30  ;;  %v540_v22 = vadd.f32 %v539_v0, %v538_v31 }
  0x7a   :  { %v563_v13 = vrot.slane %v554_v3, %v562_v16  ;;  %v546_v18 = vadd.f32 %v545_v23, %v544_v57 }
  0x7b   :  { %v570_v9 = vrot.slane %v555_v4, %v562_v16  ;;  %v556_v53 = vcombine.low %v534_v32, %v540_v22 }
  0x7c   :  { %v584_v10 = vrot.slane %v546_v18, %v562_v16 }
  0x7d   :  { %v585_v28 = vcombine.low %v563_v13, %v570_v9  ;;  %v577_v20 = vrot.slane %v556_v53, %v562_v16 }
  0x7f   :  { %v586_v6 = vcombine.low %v577_v20, %v584_v10  ;;  %v593_v19 = vrot.slane %v585_v28, %v562_v16 }
  0x81   :  { %v600_v26 = vrot.slane %v586_v6, %v562_v16 }
  0x83   :  { %v601_v46 = vcombine.low %v593_v19, %v600_v26 }
  0x85   :  { %v603_v44 = vadd.f32 %v601_v46, %v504_v7 }
  0x87   :  { %608 = vst.msk [vmem:[#allocation7] sm:$0x7f] %vm797_vm0, %v603_v44 }
  0x88   :  { %731 = shalt.err (!%p728_p6)
}
  0x89   :  { %s732_s14 = scalar_lea.hbm %s1202_s3, 112 }
  0x8a   :  { %p733_p7 = scmp.ne.s32.totalorder %s1202_s3, %s732_s14  ;;  %p736_p8 = scmp.lt.u32.totalorder %s732_s14, %s1202_s3 }
  0x8c   :  { %p738_p9 = pnand %p736_p8, %p733_p7 }
  0x8e   :  { %741 = shalt.err (!%p738_p9)
}
  0x8f   :  { %618 = dma.vmem_to_hbm [thread:$0]  %s616_s9, 112, %s1202_s3, [#allocation4]  }
  0x90   :  { %746 = dma.done.wait [#allocation4], 112  }
  0x91   :  { %747 = vsyncadd [#allocation4], 4294967184 }
  0x92   :  { %622 = vsyncpa [#allocation3], 1 }
  0x93   :  { %623 = vsyncpa [#allocation6], 1 }
  0x94   :  { %624 = vsyncpa [#allocation4], 1 }

</bundles_post_ra>
